<compile_context>
chip_gen: v7x
topology: tpu7x:2x2x1
jax: 0.10.0
libtpu: 0.0.40
codegen_flags: <defaults>
</compile_context>

<pallas_src>
import functools

import jax
import jax.numpy as jnp
from jax.experimental import pallas as pl
from jax.experimental.pallas import tpu as pltpu


def _se_kernel(x_ref, w1_ref, w2_ref, o_ref, *, bt, inv_hw):
    # x_ref : (bt, C, HWp)   current batch block (native dtype)
    # w1_ref: (C//r, C)      torch Linear(c, c//r).weight layout (out, in)
    # w2_ref: (C, C//r)      torch Linear(c//r, c).weight layout (out, in)
    w1 = w1_ref[...]
    w2 = w2_ref[...]
    for b in range(bt):  # static unroll; bt is small (<= 8)
        xb = x_ref[b]                                              # (C, HWp), native dtype
        # Global average pool (f32 accumulation). Zero padding of HW is harmless
        # because we divide by the TRUE H*W, not the padded length.
        pooled = jnp.sum(xb.astype(jnp.float32), axis=-1,
                         keepdims=True) * inv_hw                   # (C, 1)
        # fc1 -> ReLU -> fc2 -> Sigmoid, gate kept as a (C, 1) column so it
        # broadcasts along lanes for free (no XLU transposes anywhere).
        h = jnp.dot(w1, pooled, preferred_element_type=jnp.float32)  # (C//r, 1)
        h = jnp.maximum(h, 0.0)
        s = jnp.dot(w2, h, preferred_element_type=jnp.float32)       # (C, 1)
        gate = jax.nn.sigmoid(s).astype(xb.dtype)                    # (C, 1)
        # Channel-wise rescale in the NATIVE dtype (no full-tile f32 upcast).
        o_ref[b] = xb * gate                                         # (C, HWp)


def _pick_bt(B, C, HWp, itemsize):
    """Batch elements per grid step: amortize per-step overhead while keeping
    in+out double-buffered blocks (plus f32 pooling temp) well under VMEM."""
    per_b_bytes = C * HWp * itemsize
    per_b_cost = (4 * itemsize + 4) * C * HWp          # 2x dbl-buffered in/out + f32 temp
    vmem_budget = 24 * 1024 * 1024                     # headroom under 32 MiB limit (v7x: 64 MiB phys)
    target_block = 2 * 1024 * 1024                     # ~2 MiB blocks: HBM-roofline sweet spot
    cap = min(max(1, vmem_budget // per_b_cost),
              max(1, target_block // per_b_bytes),
              8)                                       # bound static unroll
    bt = 1
    for d in range(1, B + 1):
        if B % d == 0 and d <= cap:
            bt = d
    return bt


def se_block(x, w1, w2):
    """SEBlock forward.

    x : (B, C, H, W)  NCHW, matching the PyTorch module.
    w1: (C//r, C)     torch Linear(c, c//r).weight (out, in) — used directly.
    w2: (C, C//r)     torch Linear(c//r, c).weight (out, in) — used directly.
    """
    B, C, H, W = x.shape
    Cr = w1.shape[0]
    HW = H * W
    itemsize = x.dtype.itemsize

    # Lane-dense last dim: pad HW up to a multiple of 128 (unmasked vst path).
    HWp = ((HW + 127) // 128) * 128
    x_flat = x.reshape(B, C, HW)
    if HWp != HW:
        x_flat = jnp.pad(x_flat, ((0, 0), (0, 0), (0, HWp - HW)))

    bt = _pick_bt(B, C, HWp, itemsize)
    # TODO(synk): for very large C*HW (4*bt*C*HWp*itemsize > ~32 MiB even at bt=1),
    # split HW across a second grid axis (pool pass + rescale pass) instead.

    flops = int(B * C * (2 * HW + 4 * Cr))             # pool adds + rescale muls + tiny FCs
    cost = pl.CostEstimate(
        flops=flops,
        transcendentals=int(B * C),                    # sigmoid
        bytes_accessed=int(2 * B * C * HWp * itemsize
                           + 2 * C * Cr * w1.dtype.itemsize),
    )

    out_flat = pl.pallas_call(
        functools.partial(_se_kernel, bt=bt, inv_hw=1.0 / HW),
        out_shape=jax.ShapeDtypeStruct((B, C, HWp), x.dtype),
        grid_spec=pltpu.PrefetchScalarGridSpec(
            num_scalar_prefetch=0,
            grid=(B // bt,),
            in_specs=[
                pl.BlockSpec((bt, C, HWp), lambda i: (i, 0, 0)),
                pl.BlockSpec((Cr, C), lambda i: (0, 0)),   # resident weight
                pl.BlockSpec((C, Cr), lambda i: (0, 0)),   # resident weight
            ],
            out_specs=pl.BlockSpec((bt, C, HWp), lambda i: (i, 0, 0)),
        ),
        compiler_params=pltpu.CompilerParams(
            dimension_semantics=("parallel",),
            vmem_limit_bytes=32 * 1024 * 1024,             # explicit: safe on v5e/v6e/v7x
        ),
        cost_estimate=cost,
        # Note: input_output_aliases={0: 0} is valid here (block fully read
        # before written) but forces an XLA copy when the caller buffer is not
        # donated, so it is intentionally left off.
    )(x_flat, w1, w2)

    if HWp != HW:
        out_flat = out_flat[:, :, :HW]
    return out_flat.reshape(B, C, H, W)


def se_block_ref(x, w1, w2):
    """Pure-JAX reference mirroring the PyTorch forward."""
    y = jnp.mean(x, axis=(2, 3))                 # (B, C)
    y = jnp.maximum(y @ w1.T, 0.0)               # (B, C//r)
    y = jax.nn.sigmoid(y @ w2.T)                 # (B, C)
    return x * y[:, :, None, None]


if __name__ == "__main__":
    key = jax.random.PRNGKey(0)
    B, C, H, W, r = 2, 4, 16, 16, 4
    k_x, k_w1, k_w2 = jax.random.split(key, 3)

    x = jax.random.normal(k_x, (B, C, H, W), dtype=jnp.float32)
    # Linear(c, c//r) and Linear(c//r, c), no bias, torch (out, in) layout.
    w1 = jax.random.normal(k_w1, (C // r, C), dtype=jnp.float32) * 0.5
    w2 = jax.random.normal(k_w2, (C, C // r), dtype=jnp.float32) * 0.5

    out = se_block(x, w1, w2)
    jax.block_until_ready(out)

    ref = se_block_ref(x, w1, w2)
    assert out.shape == (B, C, H, W)
    assert jnp.allclose(out, ref, atol=1e-5, rtol=1e-5), "mismatch vs reference"

    print("KERNEL_OK")
</pallas_src>

<mosaic_0001>
module attributes {stable_mosaic.version = 11 : i64} {
  func.func @_se_kernel(%arg0: i32, %arg1: memref<2x4x256xf32, #tpu.memory_space<vmem>>, %arg2: memref<1x4xf32, #tpu.memory_space<vmem>>, %arg3: memref<4x1xf32, #tpu.memory_space<vmem>>, %arg4: memref<2x4x256xf32, #tpu.memory_space<vmem>>) attributes {dimension_semantics = [#tpu.dimension_semantics<parallel>], iteration_bounds = array<i64: 1>, scalar_prefetch = 0 : i64, scratch_operands = 0 : i64, tpu.core_type = #tpu.core_type<tc>, window_params = [{transform_indices = @transform_0, window_bounds = array<i64: 2, 4, 256>}, {pipeline_mode = #tpu.pipeline_mode<synchronous>, transform_indices = @transform_1, window_bounds = array<i64: 1, 4>}, {pipeline_mode = #tpu.pipeline_mode<synchronous>, transform_indices = @transform_2, window_bounds = array<i64: 4, 1>}, {transform_indices = @transform_3, window_bounds = array<i64: 2, 4, 256>}]} {
    %c0 = arith.constant 0 : index
    %c0_0 = arith.constant 0 : index
    %0 = vector.load %arg2[%c0, %c0_0] : memref<1x4xf32, #tpu.memory_space<vmem>>, vector<1x4xf32>
    %c0_1 = arith.constant 0 : index
    %c0_2 = arith.constant 0 : index
    %1 = vector.load %arg3[%c0_1, %c0_2] : memref<4x1xf32, #tpu.memory_space<vmem>>, vector<4x1xf32>
    %c0_3 = arith.constant 0 : index
    %c0_4 = arith.constant 0 : index
    %c0_5 = arith.constant 0 : index
    %2 = vector.load %arg1[%c0_3, %c0_4, %c0_5] : memref<2x4x256xf32, #tpu.memory_space<vmem>>, vector<1x4x256xf32>
    %3 = vector.shape_cast %2 : vector<1x4x256xf32> to vector<4x256xf32>
    %cst = arith.constant dense<0.000000e+00> : vector<4xf32>
    %4 = vector.multi_reduction <add>, %3, %cst [1] : vector<4x256xf32> to vector<4xf32>
    %5 = vector.shape_cast %4 : vector<4xf32> to vector<4x1xf32>
    %cst_6 = arith.constant 3.906250e-03 : f32
    %6 = vector.broadcast %cst_6 : f32 to vector<4x1xf32>
    %7 = arith.mulf %5, %6 : vector<4x1xf32>
    %cst_7 = arith.constant dense<0.000000e+00> : vector<1x1xf32>
    %8 = tpu.matmul %0, %7, %cst_7 {dimension_numbers = #tpu.dot_dimension_numbers<[1], [0], [0], [1], [0, 0, 1, 1], [], []>} : vector<1x4xf32>, vector<4x1xf32>, vector<1x1xf32> -> vector<1x1xf32>
    %cst_8 = arith.constant 0.000000e+00 : f32
    %9 = vector.broadcast %cst_8 : f32 to vector<1x1xf32>
    %10 = arith.maximumf %8, %9 : vector<1x1xf32>
    %cst_9 = arith.constant dense<0.000000e+00> : vector<4x1xf32>
    %11 = tpu.matmul %1, %10, %cst_9 {dimension_numbers = #tpu.dot_dimension_numbers<[1], [0], [0], [1], [0, 0, 1, 1], [], []>} : vector<4x1xf32>, vector<1x1xf32>, vector<4x1xf32> -> vector<4x1xf32>
    %12 = arith.negf %11 : vector<4x1xf32>
    %13 = math.exp %12 : vector<4x1xf32>
    %cst_10 = arith.constant 1.000000e+00 : f32
    %14 = vector.broadcast %cst_10 : f32 to vector<4x1xf32>
    %15 = arith.addf %14, %13 : vector<4x1xf32>
    %16 = arith.divf %14, %15 : vector<4x1xf32>
    %17 = vector.broadcast %16 : vector<4x1xf32> to vector<4x256xf32>
    %18 = arith.mulf %3, %17 : vector<4x256xf32>
    %c0_11 = arith.constant 0 : index
    %c0_12 = arith.constant 0 : index
    %c0_13 = arith.constant 0 : index
    %19 = vector.load %arg4[%c0_11, %c0_12, %c0_13] : memref<2x4x256xf32, #tpu.memory_space<vmem>>, vector<1x4x256xf32>
    %20 = vector.shape_cast %19 : vector<1x4x256xf32> to vector<4x256xf32>
    %21 = vector.shape_cast %18 : vector<4x256xf32> to vector<1x4x256xf32>
    tpu.vector_store %arg4[%c0_11, %c0_12, %c0_13], %21 {strides = array<i32>} : memref<2x4x256xf32, #tpu.memory_space<vmem>>, vector<1x4x256xf32>,
    %c1 = arith.constant 1 : index
    %c0_14 = arith.constant 0 : index
    %c0_15 = arith.constant 0 : index
    %22 = vector.load %arg1[%c1, %c0_14, %c0_15] : memref<2x4x256xf32, #tpu.memory_space<vmem>>, vector<1x4x256xf32>
    %23 = vector.shape_cast %22 : vector<1x4x256xf32> to vector<4x256xf32>
    %cst_16 = arith.constant dense<0.000000e+00> : vector<4xf32>
    %24 = vector.multi_reduction <add>, %23, %cst_16 [1] : vector<4x256xf32> to vector<4xf32>
    %25 = vector.shape_cast %24 : vector<4xf32> to vector<4x1xf32>
    %cst_17 = arith.constant 3.906250e-03 : f32
    %26 = vector.broadcast %cst_17 : f32 to vector<4x1xf32>
    %27 = arith.mulf %25, %26 : vector<4x1xf32>
    %cst_18 = arith.constant dense<0.000000e+00> : vector<1x1xf32>
    %28 = tpu.matmul %0, %27, %cst_18 {dimension_numbers = #tpu.dot_dimension_numbers<[1], [0], [0], [1], [0, 0, 1, 1], [], []>} : vector<1x4xf32>, vector<4x1xf32>, vector<1x1xf32> -> vector<1x1xf32>
    %cst_19 = arith.constant 0.000000e+00 : f32
    %29 = vector.broadcast %cst_19 : f32 to vector<1x1xf32>
    %30 = arith.maximumf %28, %29 : vector<1x1xf32>
    %cst_20 = arith.constant dense<0.000000e+00> : vector<4x1xf32>
    %31 = tpu.matmul %1, %30, %cst_20 {dimension_numbers = #tpu.dot_dimension_numbers<[1], [0], [0], [1], [0, 0, 1, 1], [], []>} : vector<4x1xf32>, vector<1x1xf32>, vector<4x1xf32> -> vector<4x1xf32>
    %32 = arith.negf %31 : vector<4x1xf32>
    %33 = math.exp %32 : vector<4x1xf32>
    %cst_21 = arith.constant 1.000000e+00 : f32
    %34 = vector.broadcast %cst_21 : f32 to vector<4x1xf32>
    %35 = arith.addf %34, %33 : vector<4x1xf32>
    %36 = arith.divf %34, %35 : vector<4x1xf32>
    %37 = vector.broadcast %36 : vector<4x1xf32> to vector<4x256xf32>
    %38 = arith.mulf %23, %37 : vector<4x256xf32>
    %c1_22 = arith.constant 1 : index
    %c0_23 = arith.constant 0 : index
    %c0_24 = arith.constant 0 : index
    %39 = vector.load %arg4[%c1_22, %c0_23, %c0_24] : memref<2x4x256xf32, #tpu.memory_space<vmem>>, vector<1x4x256xf32>
    %40 = vector.shape_cast %39 : vector<1x4x256xf32> to vector<4x256xf32>
    %41 = vector.shape_cast %38 : vector<4x256xf32> to vector<1x4x256xf32>
    tpu.vector_store %arg4[%c1_22, %c0_23, %c0_24], %41 {strides = array<i32>} : memref<2x4x256xf32, #tpu.memory_space<vmem>>, vector<1x4x256xf32>,
    return
  }
  func.func @transform_0(%arg0: i32) -> (i32, i32, i32) {
    %c0_i32 = arith.constant 0 : i32
    %c0_i32_0 = arith.constant 0 : i32
    %c0_i32_1 = arith.constant 0 : i32
    return %arg0, %c0_i32, %c0_i32_0 : i32, i32, i32
  }
  func.func @transform_1(%arg0: i32) -> (i32, i32) {
    %c0_i32 = arith.constant 0 : i32
    %c0_i32_0 = arith.constant 0 : i32
    %c0_i32_1 = arith.constant 0 : i32
    return %c0_i32, %c0_i32_0 : i32, i32
  }
  func.func @transform_2(%arg0: i32) -> (i32, i32) {
    %c0_i32 = arith.constant 0 : i32
    %c0_i32_0 = arith.constant 0 : i32
    %c0_i32_1 = arith.constant 0 : i32
    return %c0_i32, %c0_i32_0 : i32, i32
  }
  func.func @transform_3(%arg0: i32) -> (i32, i32, i32) {
    %c0_i32 = arith.constant 0 : i32
    %c0_i32_0 = arith.constant 0 : i32
    %c0_i32_1 = arith.constant 0 : i32
    return %arg0, %c0_i32, %c0_i32_0 : i32, i32, i32
  }
}

</mosaic_0001>

<bundles_post_ra>
// kernel: tpu_custom_call.1
= control target key start
LH: loop header
LB: loop body
LE: loop exit
PB: predicated region body
PF: predicated region fallthrough
CT: control target
= control target key end

     0   :  { %8 = vsyncpa [#allocation3], 0  ;;  %s606_s0 = inlined_call_operand.hbm [shape: f32[2,4,256], index: 0, kind: input, shape index: {}]   ;;  %s607_s1 = inlined_call_operand.vmem [shape: f32[1,4], index: 1, kind: input, shape index: {}]   ;;  %s608_s2 = inlined_call_operand.vmem [shape: f32[4,1], index: 2, kind: input, shape index: {}]   ;;  %s609_s3 = inlined_call_operand.hbm [shape: f32[2,4,256], index: 3, kind: output, shape index: {}]  }
   0x1   :  { %9 = vsyncpa [#allocation4], 0  ;;  %s520_s12 = smov [#allocation2]   ;;  %s472_s16 = scalar_lea.hbm %s606_s0, 256 }
   0x2   :  { %s15_s13 = sshll.u32 %s520_s12, 4  ;;  %p473_p0 = scmp.ne.s32.totalorder %s606_s0, %s472_s16  ;;  %s16_s13 = int_to_ptr.vmem [resolvable:$true] %s15_s13 }
   0x3   :  { %p476_p1 = scmp.lt.u32.totalorder %s472_s16, %s606_s0 }
   0x5   :  { %p478_p2 = pnand %p476_p1, %p473_p0 }
   0x7   :  { %481 = shalt.err (!%p478_p2)
}
   0x8   :  { %s482_s21 = scalar_lea.vmem %s16_s13, 256  ;;  %p487_p4 = scmp.lt.s32.totalorder %s16_s13, %s16_s13 }
   0x9   :  { %p483_p3 = scmp.ne.s32.totalorder %s16_s13, %s482_s21  ;;  %p488_p5 = scmp.lt.s32.totalorder %s482_s21, %s482_s21 }
   0xb   :  { %p489_p6 = por %p488_p5, %p487_p4 }
   0xd   :  { %p490_p7 = pnand %p489_p6, %p483_p3 }
   0xf   :  { %493 = shalt.err (!%p490_p7)
}
  0x10   :  { %s521_s22 = smov 128   ;;  %s522_s23 = smov 8  }
  0x11   :  { %21 = dma.hbm_to_vmem [thread:$0]  %s606_s0, 256, %s16_s13, [#allocation3], %s521_s22, %s521_s22, %s522_s23  }
  0x12   :  { %516 = dma.done.wait [#allocation3], 256  }
  0x13   :  { %517 = vsyncadd [#allocation3], 4294967040  ;;  %vm35_vm0 = vcmask 1043456   ;;  %v563_v0 = vld [vmem:[#allocation2] sm:$0xff]  ;;  %v565_v1 = vld [vmem:[#allocation2 + $0x8] sm:$0xff]  ;;  %v523_v10 = vmov 0.0   ;;  %v211_v38 = vlaneseq }
  0x14   :  { %v33_v2 = vcombine.high %v563_v0, %v563_v0  ;;  %v36_v3 = vsel %vm35_vm0, %v563_v0, 0.0  ;;  %v221_v4 = vcombine.high %v565_v1, %v565_v1  ;;  %v223_v6 = vsel %vm35_vm0, %v565_v1, 0.0  ;;  %432 = vmatprep.subr.mxu0 %v523_v10  ;;  %437 = vmatprep.subr.mxu1 %v523_v10  ;;  %v29_v13 = vld [vmem:[%s607_s1] sm:$0x1]  ;;  %s527_s1 = smov [#allocation5]  }
  0x15   :  { %vm524_vm1 = vmmov 0   ;;  %vm42_vm2 = vcmask 31744   ;;  %vm124_vm3 = vcmask 1040384   ;;  %v30_v19 = vld [vmem:[%s608_s2] sm:$0xf]  ;;  %vm120_vm4 = vcmask 7168  }
  0x16   :  { %v37_v5 = vsel %vm35_vm0, %v33_v2, 0.0  ;;  %v224_v7 = vsel %vm35_vm0, %v221_v4, 0.0  ;;  %434 = vmatprep.mubr.msk.f32.mxu0 %vm524_vm1, %v523_v10  ;;  %439 = vmatprep.mubr.msk.f32.mxu1 %vm524_vm1, %v523_v10  ;;  %v525_v23 = vmov 0   ;;  %v526_v36 = vmov 839922192   ;;  %s402_s2 = sshll.u32 %s527_s1, 4  ;;  %s403_s2 = int_to_ptr.vmem [resolvable:$true] %s402_s2 }
  0x17   :  { %v38_v8 = vadd.f32 %v37_v5, %v36_v3  ;;  %v225_v9 = vadd.f32 %v224_v7, %v223_v6  ;;  %460 = vset.pattern.permute.xlu1 %v525_v23  ;;  %461 = vset.pattern.permute.xlu0 %v525_v23  ;;  %v209_v37 = vunpack.c.l.s4 %v526_v36  ;;  %v212_v40 = vshrl.u32 %v211_v38, 7  ;;  %s494_s29 = scalar_lea.vmem %s403_s2, 256  ;;  %p499_p9 = scmp.lt.s32.totalorder %s403_s2, %s403_s2 }
  0x18   :  { %p495_p8 = scmp.ne.s32.totalorder %s403_s2, %s494_s29  ;;  %p500_p10 = scmp.lt.s32.totalorder %s494_s29, %s494_s29 }
  0x19   :  { %39 = vadd.xlane.f32.xlu0 %v38_v8  ;;  %v210_v39 = vunpack.c.0.s8 %v209_v37 }
  0x1a   :  { %p501_p11 = por %p500_p10, %p499_p9 }
  0x1b   :  { %v213_v41 = vsub.s32 %v210_v39, %v212_v40 }
  0x1c   :  { %p502_p12 = pnand %p501_p11, %p495_p8 }
  0x1d   :  { %226 = vadd.xlane.f32.xlu0 %v225_v9 }
  0xa6   :  { %v40_v11 = vpop.xlane.xlu0 %39 }
  0xa7   :  { %v41_v12 = vmul.f32 0.00390625, %v40_v11 }
  0xa9   :  { %433 = vmatpush3.msk.msra.mxu0 %vm35_vm0, %v41_v12 }
  0xaa   :  { %v227_v14 = vpop.xlane.xlu0 %226  ;;  %435 = vmatmul.mubr.msk.f32.vlgmr.msra.gmra.mrb[0].mxu0 %vm42_vm2, %v29_v13  ;;  %442 = vmatprep.subr.mxu0 %v523_v10 }
  0xab   :  { %v228_v15 = vmul.f32 0.00390625, %v227_v14  ;;  %444 = vmatprep.mubr.msk.f32.mxu0 %vm524_vm1, %v523_v10 }
  0xad   :  { %443 = vmatpush3.msk.msra.mxu0 %vm35_vm0, %v228_v15 }
  0xae   :  { %445 = vmatmul.mubr.msk.f32.vlgmr.msra.gmra.mrb[2].mxu0 %vm42_vm2, %v29_v13 }
 0x17d   :  { %v115_v16 = vpop.f32.mrb[0].mxu0 }
 0x17e   :  { %v119_v17 = vmax.f32 %v115_v16, 0.0  ;;  %v436_v18 = vpop.f32.mrb[1].mxu0 }
 0x180   :  { %438 = vmatpush3.msk.msra.mxu1 %vm124_vm3, %v119_v17 }
 0x181   :  { %440 = vmatmul.mubr.msk.f32.vlgmr.msra.gmra.mrb[0].mxu1 %vm120_vm4, %v30_v19  ;;  %v298_v20 = vpop.f32.mrb[2].mxu0  ;;  %447 = vmatprep.subr.mxu1 %v523_v10 }
 0x182   :  { %v302_v21 = vmax.f32 %v298_v20, 0.0  ;;  %v446_v22 = vpop.f32.mrb[3].mxu0  ;;  %449 = vmatprep.mubr.msk.f32.mxu1 %vm524_vm1, %v523_v10 }
 0x184   :  { %448 = vmatpush3.msk.msra.mxu1 %vm124_vm3, %v302_v21 }
 0x185   :  { %450 = vmatmul.mubr.msk.f32.vlgmr.msra.gmra.mrb[2].mxu1 %vm120_vm4, %v30_v19 }
 0x254   :  { %v194_v24 = vpop.f32.mrb[0].mxu1 }
 0x255   :  { %v418_v25 = vmul.f32 -1.442695, %v194_v24  ;;  %v441_v26 = vpop.f32.mrb[1].mxu1 }
 0x257   :  { %464 = vpow2.f32 %v418_v25 }
 0x258   :  { %v372_v27 = vpop.f32.mrb[2].mxu1 }
 0x259   :  { %v423_v28 = vmul.f32 -1.442695, %v372_v27  ;;  %v451_v29 = vpop.f32.mrb[3].mxu1 }
 0x25b   :  { %466 = vpow2.f32 %v423_v28 }
 0x261   :  { %v465_v30 = vpop.eup %464 }
 0x262   :  { %v201_v31 = vadd.f32 1.0, %v465_v30 }
 0x264   :  { %468 = vrcp.f32 %v201_v31 }
 0x265   :  { %v467_v32 = vpop.eup %466 }
 0x266   :  { %v379_v33 = vadd.f32 1.0, %v467_v32 }
 0x268   :  { %470 = vrcp.f32 %v379_v33 }
 0x26e   :  { %v469_v34 = vpop.eup %468 }
 0x26f   :  { %206 = vperm.xlu1 %460, %v469_v34  }
 0x272   :  { %v471_v35 = vpop.eup %470 }
 0x273   :  { %384 = vperm.xlu1 %460, %v471_v35  }
 0x2ee   :  { %v207_v42 = vpop.permute.xlu1 %206 }
 0x2ef   :  { %v214_v43 = vrot.slane %v207_v42, %v213_v41 }
 0x2f1   :  { %v216_v44 = vmul.f32 %v214_v43, %v563_v0 }
 0x2f2   :  { %v385_v45 = vpop.permute.xlu1 %384 }
 0x2f3   :  { %217 = vst [vmem:[#allocation5] sm:$0xff] %v216_v44  ;;  %v392_v46 = vrot.slane %v385_v45, %v213_v41 }
 0x2f5   :  { %v394_v47 = vmul.f32 %v392_v46, %v565_v1 }
 0x2f7   :  { %396 = vst [vmem:[#allocation5 + $0x8] sm:$0xff] %v394_v47 }
 0x2f8   :  { %505 = shalt.err (!%p502_p12)
}
 0x2f9   :  { %s506_s5 = scalar_lea.hbm %s609_s3, 256 }
 0x2fa   :  { %p507_p13 = scmp.ne.s32.totalorder %s609_s3, %s506_s5  ;;  %p510_p0 = scmp.lt.u32.totalorder %s506_s5, %s609_s3 }
 0x2fc   :  { %p512_p1 = pnand %p510_p0, %p507_p13 }
 0x2fe   :  { %515 = shalt.err (!%p512_p1)
}
 0x2ff   :  { %408 = dma.vmem_to_hbm [thread:$0]  %s403_s2, 256, %s609_s3, [#allocation4], %s521_s22, %s521_s22, %s522_s23  }
 0x300   :  { %518 = dma.done.wait [#allocation4], 256  }
 0x301   :  { %519 = vsyncadd [#allocation4], 4294967040 }
 0x302   :  { %412 = vsyncpa [#allocation3], 1 }
 0x303   :  { %413 = vsyncpa [#allocation4], 1 }

</bundles_post_ra>
